<compile_context>
chip_gen: v6e
topology: v6e:2x2x1
jax: 0.10.0
libtpu: 0.0.40
codegen_flags: <defaults>
</compile_context>

<pallas_src>
import functools

import jax
import jax.numpy as jnp
from jax.experimental import pallas as pl
from jax.experimental.pallas import tpu as pltpu


def _nvp_kernel(n_hidden, fd, approx_sigmoid, compute_logdet, *refs):
    if compute_logdet:
        (z_ref, mask_ref, w1_ref, b1_ref, wh_ref, bh_ref, wms_ref, bms_ref,
         ind_ref, zout_ref, logdet_ref) = refs
    else:
        (z_ref, mask_ref, w1_ref, b1_ref, wh_ref, bh_ref, wms_ref, bms_ref,
         zout_ref) = refs

    z = z_ref[...]                          # (TB, FD) f32, lane-dense packed rows
    mask = mask_ref[...]                    # (1, FD), broadcasts over batch
    one_minus_mask = 1.0 - mask             # hoisted, reused below

    cdt = w1_ref.dtype                      # MXU compute dtype (f32 or bf16)

    # first_layer: Tanh(Linear(mask * z))  (block-diag weights => per-group math)
    h = jnp.tanh(
        jnp.dot((mask * z).astype(cdt), w1_ref[...],
                preferred_element_type=jnp.float32)
        + b1_ref[...]
    )

    # hidden_layer: n_hidden x Tanh(Linear)  (static unroll, static ref indices)
    for i in range(n_hidden):
        h = jnp.tanh(
            jnp.dot(h.astype(cdt), wh_ref[i],
                    preferred_element_type=jnp.float32)
            + bh_ref[i]
        )

    # fused [mu | sigma] projection: mu occupies lanes [0, FD), the sigma
    # pre-activation lanes [FD, 2*FD) -> the split below is a whole-vreg view
    # (no sub-vreg lane shifts) when FD == 128.
    ms = jnp.dot(h.astype(cdt), wms_ref[...],
                 preferred_element_type=jnp.float32) + bms_ref[...]
    mu = ms[:, :fd]
    s = ms[:, fd:]                          # sigma pre-activation

    # shared-exp sigmoid / log-sigmoid (single exp on the EUP; log1p avoids
    # the log(0) hazard of log(sigmoid(s)))
    e = jnp.exp(-s)
    denom = 1.0 + e
    if approx_sigmoid:
        sigma = pl.reciprocal(denom, approx=True)
    else:
        sigma = 1.0 / denom

    # affine coupling (refactored: one fewer VPU multiply per element)
    z_new = one_minus_mask * (mu + sigma * (z - mu)) + mask * z
    zout_ref[...] = z_new.astype(zout_ref.dtype)

    if compute_logdet:
        log_sigma = -jnp.log1p(e)
        # per-group feature reduction via a tiny matmul against the (FD, F)
        # group indicator -> (TB, F): one original row's logdet per lane.
        logdet_ref[...] = jnp.dot(one_minus_mask * log_sigma, ind_ref[...],
                                  preferred_element_type=jnp.float32)


def _padded_bytes(shape, dtype):
    """VMEM footprint of a buffer, accounting for (sublane, 128-lane) padding."""
    item = jnp.dtype(dtype).itemsize
    dims = (1,) * max(0, 2 - len(shape)) + tuple(int(x) for x in shape)
    *lead, s, l = dims
    sub = max(8, 32 // item)                     # f32 -> 8 sublanes, bf16 -> 16
    s_p = pl.cdiv(s, sub) * sub
    l_p = pl.cdiv(l, 128) * 128
    n = 1
    for x in lead:
        n *= x
    return n * s_p * l_p * item


def single_masked_nvp_flow(z, mask, params, *, n_hidden, kl=True,
                           use_bf16=False, approx_sigmoid=False,
                           batch_tile=8192):
    """Pallas forward of SingleMaskedNVPFlow (training mode: explicit mask).

    z:    (B, D) or (D,) float32
    mask: (D,)   float32 (Bernoulli mask from reset_noise(); pass 0.5*ones for
          eval-mode semantics)
    params: dict with w1 (D,H), b1 (H,), wh (n_hidden,H,H), bh (n_hidden,H),
            wmu (H,D), bmu (D,), wsig (H,D), bsig (D,)  -- weights are [in, out].

    Notes: use_bf16 is opt-in (keep f32 on v5e which has no bf16 VPU/EUP; on
    v6e/v7x the packed K=256 matmuls benefit if looser tolerance is ok).
    """
    squeeze = (z.ndim == 1)
    if squeeze:
        z = z[None, :]
    B, D = z.shape
    H = params["w1"].shape[1]

    # Lane-folding factor: fold F rows into the 128-lane dimension so every
    # vector op / store is lane-dense and the MXU K/N dims are filled.
    F = (128 // D) if (D <= 128 and 128 % D == 0) else 1
    FD, FH = F * D, F * H

    # Pad the batch to a multiple of 8*F so packed rows come in full sublane
    # groups (all in-kernel matmuls get M >= 8, multiple of 8).
    ROWS = 8 * F
    B_pad = pl.cdiv(B, ROWS) * ROWS
    z_p = z.astype(jnp.float32)
    if B_pad != B:
        z_p = jnp.pad(z_p, ((0, B_pad - B), (0, 0)))
    Bp = B_pad // F
    z_p = z_p.reshape(Bp, FD)                    # free view: rows are contiguous

    wdt = jnp.bfloat16 if use_bf16 else jnp.float32
    eyeF = jnp.eye(F, dtype=jnp.float32)

    def blkdiag(w):                              # (in, out) -> (F*in, F*out)
        return jnp.kron(eyeF, w.astype(jnp.float32))

    w1 = blkdiag(params["w1"]).astype(wdt)                              # (FD, FH)
    if n_hidden > 0:
        wh = jnp.stack([blkdiag(params["wh"][i])
                        for i in range(n_hidden)]).astype(wdt)          # (nh, FH, FH)
        bh = jnp.tile(params["bh"].astype(jnp.float32),
                      (1, F)).reshape(n_hidden, 1, FH)
    else:
        wh = jnp.zeros((1, FH, FH), wdt)
        bh = jnp.zeros((1, 1, FH), jnp.float32)
    n_h_arr = wh.shape[0]

    # mu weights in output lanes [0, FD), sigma weights in [FD, 2*FD):
    wms = jnp.concatenate([blkdiag(params["wmu"]),
                           blkdiag(params["wsig"])], axis=1).astype(wdt)  # (FH, 2FD)

    b1 = jnp.tile(params["b1"].astype(jnp.float32), F).reshape(1, FH)
    bms = jnp.concatenate([jnp.tile(params["bmu"], F),
                           jnp.tile(params["bsig"], F)]
                          ).astype(jnp.float32).reshape(1, 2 * FD)
    mask_t = jnp.tile(mask.astype(jnp.float32), F).reshape(1, FD)
    ind = jnp.repeat(jnp.eye(F, dtype=jnp.float32), D, axis=0)           # (FD, F)

    # ---- batch tile (packed rows) ------------------------------------------
    TB = min(Bp, max(8, (pl.cdiv(batch_tile, F) // 8) * 8))
    if Bp >= 16:
        # guarantee >= 2 grid steps so both v7x TensorCores get work
        TB = min(TB, max(8, ((Bp // 2) // 8) * 8))

    # ---- lane-padding-aware VMEM budget (v7x-safe: 32 MiB scoped default) ---
    weight_bytes = (_padded_bytes(w1.shape, wdt)
                    + _padded_bytes(wh.shape, wdt)
                    + _padded_bytes(wms.shape, wdt)
                    + _padded_bytes(b1.shape, jnp.float32)
                    + _padded_bytes(bh.shape, jnp.float32)
                    + _padded_bytes(bms.shape, jnp.float32)
                    + _padded_bytes(mask_t.shape, jnp.float32)
                    + _padded_bytes(ind.shape, jnp.float32))

    def footprint(tb):
        io = (_padded_bytes((tb, FD), jnp.float32) * 2                  # z + zout
              + (_padded_bytes((tb, F), jnp.float32) if kl else 0))     # logdet
        act = (3 * _padded_bytes((tb, FH), jnp.float32)                 # h + temps
               + _padded_bytes((tb, 2 * FD), jnp.float32)               # ms
               + 8 * _padded_bytes((tb, FD), jnp.float32))              # mu/s/e/...
        return 2 * weight_bytes + 2 * io + act                          # x2 buffers

    while TB > 8 and footprint(TB) > (20 << 20):
        TB = max(8, ((TB // 2) // 8) * 8)

    vmem_limit = int(min(max(2 * footprint(TB), 16 << 20), 30 << 20))
    grid = (pl.cdiv(Bp, TB),)

    # ---- specs ---------------------------------------------------------------
    const2 = lambda shape: pl.BlockSpec(shape, lambda i: (0, 0))
    const3 = lambda shape: pl.BlockSpec(shape, lambda i: (0, 0, 0))

    in_specs = [
        pl.BlockSpec((TB, FD), lambda i: (i, 0)),     # z (tiled over packed batch)
        const2((1, FD)),                              # mask     (resident)
        const2((FD, FH)),                             # w1 block-diag
        const2((1, FH)),                              # b1
        const3((n_h_arr, FH, FH)),                    # wh stacked block-diag
        const3((n_h_arr, 1, FH)),                     # bh
        const2((FH, 2 * FD)),                         # wms = [blkdiag(wmu)|blkdiag(wsig)]
        const2((1, 2 * FD)),                          # bms
    ]
    inputs = [z_p, mask_t, w1, b1, wh, bh, wms, bms]

    out_shapes = [jax.ShapeDtypeStruct((Bp, FD), jnp.float32)]
    out_specs = [pl.BlockSpec((TB, FD), lambda i: (i, 0))]
    if kl:
        in_specs.append(const2((FD, F)))              # group indicator for logdet
        inputs.append(ind)
        out_shapes.append(jax.ShapeDtypeStruct((Bp, F), jnp.float32))
        out_specs.append(pl.BlockSpec((TB, F), lambda i: (i, 0)))

    outs = pl.pallas_call(
        functools.partial(_nvp_kernel, n_hidden, FD, approx_sigmoid, kl),
        out_shape=tuple(out_shapes),
        grid=grid,
        in_specs=in_specs,
        out_specs=tuple(out_specs),
        compiler_params=pltpu.CompilerParams(
            dimension_semantics=("parallel",),        # packed-batch tiles independent
            vmem_limit_bytes=vmem_limit,
        ),
    )(*inputs)

    z_out = outs[0].reshape(B_pad, D)[:B]
    if kl:
        logdet = outs[1].reshape(B_pad)[:B]
        if squeeze:
            return z_out[0], logdet[0]
        return z_out, logdet
    if squeeze:
        return z_out[0]
    return z_out


def _reference(z, mask, params, n_hidden):
    mask = mask.reshape(1, -1)
    h = jnp.tanh((mask * z) @ params["w1"] + params["b1"])
    for i in range(n_hidden):
        h = jnp.tanh(h @ params["wh"][i] + params["bh"][i])
    mu = h @ params["wmu"] + params["bmu"]
    sigma = jax.nn.sigmoid(h @ params["wsig"] + params["bsig"])
    z_new = (1 - mask) * (z * sigma + (1 - sigma) * mu) + mask * z
    logdet = ((1 - mask) * jnp.log(sigma)).sum(1)
    return z_new, logdet


if __name__ == "__main__":
    # Small, module-consistent shapes: batch=8, input_dim=16, hidden=32, n_hidden=2
    B, D, H, N_HIDDEN = 8, 16, 32, 2

    key = jax.random.PRNGKey(0)
    ks = jax.random.split(key, 13)

    params = {
        # weights are stored as [in, out] (transposed vs torch's [out, in])
        "w1":   0.1 * jax.random.normal(ks[0], (D, H), jnp.float32),
        "b1":   0.1 * jax.random.normal(ks[1], (H,), jnp.float32),
        "wh":   0.1 * jax.random.normal(ks[2], (N_HIDDEN, H, H), jnp.float32),
        "bh":   0.1 * jax.random.normal(ks[3], (N_HIDDEN, H), jnp.float32),
        "wmu":  0.1 * jax.random.normal(ks[4], (H, D), jnp.float32),
        "bmu":  0.1 * jax.random.normal(ks[5], (D,), jnp.float32),
        "wsig": 0.1 * jax.random.normal(ks[6], (H, D), jnp.float32),
        "bsig": 0.1 * jax.random.normal(ks[7], (D,), jnp.float32),
    }

    z = jax.random.normal(ks[8], (B, D), jnp.float32)
    # training-mode mask: deterministic Bernoulli(0.5) from reset_noise()
    mask = jax.random.bernoulli(ks[9], 0.5, (D,)).astype(jnp.float32)

    z_ref, ld_ref = _reference(z, mask, params, N_HIDDEN)

    # f32 MXU path (default): tight check against the pure-JAX reference.
    z_out, logdet = single_masked_nvp_flow(z, mask, params, n_hidden=N_HIDDEN, kl=True)
    jax.block_until_ready((z_out, logdet))
    assert z_out.shape == (B, D) and logdet.shape == (B,)
    assert jnp.allclose(z_out, z_ref, atol=1e-5, rtol=1e-5)
    assert jnp.allclose(logdet, ld_ref, atol=1e-5, rtol=1e-5)

    # Larger batch: exercises the multi-step grid path (>= 2 parallel tiles).
    B2 = 200
    z2 = jax.random.normal(ks[10], (B2, D), jnp.float32)
    z2_ref, ld2_ref = _reference(z2, mask, params, N_HIDDEN)
    z2_out, ld2 = single_masked_nvp_flow(z2, mask, params, n_hidden=N_HIDDEN, kl=True)
    jax.block_until_ready((z2_out, ld2))
    assert jnp.allclose(z2_out, z2_ref, atol=1e-5, rtol=1e-5)
    assert jnp.allclose(ld2, ld2_ref, atol=1e-5, rtol=1e-5)

    # Batch not a multiple of the lane-fold group: exercises wrapper padding.
    B3 = 13
    z3 = jax.random.normal(ks[11], (B3, D), jnp.float32)
    z3_ref, ld3_ref = _reference(z3, mask, params, N_HIDDEN)
    z3_out, ld3 = single_masked_nvp_flow(z3, mask, params, n_hidden=N_HIDDEN, kl=True)
    jax.block_until_ready((z3_out, ld3))
    assert jnp.allclose(z3_out, z3_ref, atol=1e-5, rtol=1e-5)
    assert jnp.allclose(ld3, ld3_ref, atol=1e-5, rtol=1e-5)

    # bf16 MXU path (weights/activation casts only): looser tolerance by design.
    z_bf, ld_bf = single_masked_nvp_flow(z, mask, params, n_hidden=N_HIDDEN,
                                         kl=True, use_bf16=True)
    jax.block_until_ready((z_bf, ld_bf))
    assert jnp.allclose(z_bf, z_ref, atol=5e-2, rtol=5e-2)
    assert jnp.allclose(ld_bf, ld_ref, atol=5e-2, rtol=5e-2)

    # approx-reciprocal sigmoid path (opt-in): looser tolerance by design.
    z_ap, ld_ap = single_masked_nvp_flow(z, mask, params, n_hidden=N_HIDDEN,
                                         kl=True, approx_sigmoid=True)
    jax.block_until_ready((z_ap, ld_ap))
    assert jnp.allclose(z_ap, z_ref, atol=1e-2, rtol=1e-2)
    assert jnp.allclose(ld_ap, ld_ref, atol=1e-2, rtol=1e-2)

    # kl=False path: separate variant without logdet compute/store.
    z_only = single_masked_nvp_flow(z, mask, params, n_hidden=N_HIDDEN, kl=False)
    jax.block_until_ready(z_only)
    assert jnp.allclose(z_only, z_ref, atol=1e-5, rtol=1e-5)

    print("KERNEL_OK")
</pallas_src>

<mosaic_0001>
module attributes {stable_mosaic.version = 11 : i64} {
  func.func @_nvp_kernel(%arg0: i32, %arg1: memref<8x128xf32, #tpu.memory_space<vmem>>, %arg2: memref<1x128xf32, #tpu.memory_space<vmem>>, %arg3: memref<128x256xf32, #tpu.memory_space<vmem>>, %arg4: memref<1x256xf32, #tpu.memory_space<vmem>>, %arg5: memref<2x256x256xf32, #tpu.memory_space<vmem>>, %arg6: memref<2x1x256xf32, #tpu.memory_space<vmem>>, %arg7: memref<256x256xf32, #tpu.memory_space<vmem>>, %arg8: memref<1x256xf32, #tpu.memory_space<vmem>>, %arg9: memref<128x8xf32, #tpu.memory_space<vmem>>, %arg10: memref<8x128xf32, #tpu.memory_space<vmem>>, %arg11: memref<8x8xf32, #tpu.memory_space<vmem>>) attributes {dimension_semantics = [#tpu.dimension_semantics<parallel>], iteration_bounds = array<i64: 1>, scalar_prefetch = 0 : i64, scratch_operands = 0 : i64, tpu.core_type = #tpu.core_type<tc>, window_params = [{transform_indices = @transform_0, window_bounds = array<i64: 8, 128>}, {pipeline_mode = #tpu.pipeline_mode<synchronous>, transform_indices = @transform_1, window_bounds = array<i64: 1, 128>}, {pipeline_mode = #tpu.pipeline_mode<synchronous>, transform_indices = @transform_2, window_bounds = array<i64: 128, 256>}, {pipeline_mode = #tpu.pipeline_mode<synchronous>, transform_indices = @transform_3, window_bounds = array<i64: 1, 256>}, {pipeline_mode = #tpu.pipeline_mode<synchronous>, transform_indices = @transform_4, window_bounds = array<i64: 2, 256, 256>}, {pipeline_mode = #tpu.pipeline_mode<synchronous>, transform_indices = @transform_5, window_bounds = array<i64: 2, 1, 256>}, {pipeline_mode = #tpu.pipeline_mode<synchronous>, transform_indices = @transform_6, window_bounds = array<i64: 256, 256>}, {pipeline_mode = #tpu.pipeline_mode<synchronous>, transform_indices = @transform_7, window_bounds = array<i64: 1, 256>}, {pipeline_mode = #tpu.pipeline_mode<synchronous>, transform_indices = @transform_8, window_bounds = array<i64: 128, 8>}, {transform_indices = @transform_9, window_bounds = array<i64: 8, 128>}, {transform_indices = @transform_10, window_bounds = array<i64: 8, 8>}]} {
    %c0 = arith.constant 0 : index
    %c0_0 = arith.constant 0 : index
    %0 = vector.load %arg1[%c0, %c0_0] : memref<8x128xf32, #tpu.memory_space<vmem>>, vector<8x128xf32>
    %c0_1 = arith.constant 0 : index
    %c0_2 = arith.constant 0 : index
    %1 = vector.load %arg2[%c0_1, %c0_2] : memref<1x128xf32, #tpu.memory_space<vmem>>, vector<1x128xf32>
    %cst = arith.constant 1.000000e+00 : f32
    %2 = vector.broadcast %cst : f32 to vector<1x128xf32>
    %3 = arith.subf %2, %1 : vector<1x128xf32>
    %4 = vector.broadcast %1 : vector<1x128xf32> to vector<8x128xf32>
    %5 = arith.mulf %4, %0 : vector<8x128xf32>
    %c0_3 = arith.constant 0 : index
    %c0_4 = arith.constant 0 : index
    %6 = vector.load %arg3[%c0_3, %c0_4] : memref<128x256xf32, #tpu.memory_space<vmem>>, vector<128x256xf32>
    %cst_5 = arith.constant dense<0.000000e+00> : vector<8x256xf32>
    %7 = tpu.matmul %5, %6, %cst_5 {dimension_numbers = #tpu.dot_dimension_numbers<[1], [0], [0], [1], [0, 0, 1, 1], [], []>} : vector<8x128xf32>, vector<128x256xf32>, vector<8x256xf32> -> vector<8x256xf32>
    %c0_6 = arith.constant 0 : index
    %c0_7 = arith.constant 0 : index
    %8 = vector.load %arg4[%c0_6, %c0_7] : memref<1x256xf32, #tpu.memory_space<vmem>>, vector<1x256xf32>
    %9 = vector.broadcast %8 : vector<1x256xf32> to vector<8x256xf32>
    %10 = arith.addf %7, %9 : vector<8x256xf32>
    %11 = math.tanh %10 : vector<8x256xf32>
    %c0_8 = arith.constant 0 : index
    %c0_9 = arith.constant 0 : index
    %c0_10 = arith.constant 0 : index
    %12 = vector.load %arg5[%c0_8, %c0_9, %c0_10] : memref<2x256x256xf32, #tpu.memory_space<vmem>>, vector<1x256x256xf32>
    %13 = vector.shape_cast %12 : vector<1x256x256xf32> to vector<256x256xf32>
    %cst_11 = arith.constant dense<0.000000e+00> : vector<8x256xf32>
    %14 = tpu.matmul %11, %13, %cst_11 {dimension_numbers = #tpu.dot_dimension_numbers<[1], [0], [0], [1], [0, 0, 1, 1], [], []>} : vector<8x256xf32>, vector<256x256xf32>, vector<8x256xf32> -> vector<8x256xf32>
    %c0_12 = arith.constant 0 : index
    %c0_13 = arith.constant 0 : index
    %c0_14 = arith.constant 0 : index
    %15 = vector.load %arg6[%c0_12, %c0_13, %c0_14] : memref<2x1x256xf32, #tpu.memory_space<vmem>>, vector<1x1x256xf32>
    %16 = vector.shape_cast %15 : vector<1x1x256xf32> to vector<1x256xf32>
    %17 = vector.broadcast %16 : vector<1x256xf32> to vector<8x256xf32>
    %18 = arith.addf %14, %17 : vector<8x256xf32>
    %19 = math.tanh %18 : vector<8x256xf32>
    %c1 = arith.constant 1 : index
    %c0_15 = arith.constant 0 : index
    %c0_16 = arith.constant 0 : index
    %20 = vector.load %arg5[%c1, %c0_15, %c0_16] : memref<2x256x256xf32, #tpu.memory_space<vmem>>, vector<1x256x256xf32>
    %21 = vector.shape_cast %20 : vector<1x256x256xf32> to vector<256x256xf32>
    %cst_17 = arith.constant dense<0.000000e+00> : vector<8x256xf32>
    %22 = tpu.matmul %19, %21, %cst_17 {dimension_numbers = #tpu.dot_dimension_numbers<[1], [0], [0], [1], [0, 0, 1, 1], [], []>} : vector<8x256xf32>, vector<256x256xf32>, vector<8x256xf32> -> vector<8x256xf32>
    %c1_18 = arith.constant 1 : index
    %c0_19 = arith.constant 0 : index
    %c0_20 = arith.constant 0 : index
    %23 = vector.load %arg6[%c1_18, %c0_19, %c0_20] : memref<2x1x256xf32, #tpu.memory_space<vmem>>, vector<1x1x256xf32>
    %24 = vector.shape_cast %23 : vector<1x1x256xf32> to vector<1x256xf32>
    %25 = vector.broadcast %24 : vector<1x256xf32> to vector<8x256xf32>
    %26 = arith.addf %22, %25 : vector<8x256xf32>
    %27 = math.tanh %26 : vector<8x256xf32>
    %c0_21 = arith.constant 0 : index
    %c0_22 = arith.constant 0 : index
    %28 = vector.load %arg7[%c0_21, %c0_22] : memref<256x256xf32, #tpu.memory_space<vmem>>, vector<256x256xf32>
    %cst_23 = arith.constant dense<0.000000e+00> : vector<8x256xf32>
    %29 = tpu.matmul %27, %28, %cst_23 {dimension_numbers = #tpu.dot_dimension_numbers<[1], [0], [0], [1], [0, 0, 1, 1], [], []>} : vector<8x256xf32>, vector<256x256xf32>, vector<8x256xf32> -> vector<8x256xf32>
    %c0_24 = arith.constant 0 : index
    %c0_25 = arith.constant 0 : index
    %30 = vector.load %arg8[%c0_24, %c0_25] : memref<1x256xf32, #tpu.memory_space<vmem>>, vector<1x256xf32>
    %31 = vector.broadcast %30 : vector<1x256xf32> to vector<8x256xf32>
    %32 = arith.addf %29, %31 : vector<8x256xf32>
    %33 = vector.extract_strided_slice %32 {offsets = [0, 0], sizes = [8, 128], strides = [1, 1]} : vector<8x256xf32> to vector<8x128xf32>
    %34 = vector.extract_strided_slice %32 {offsets = [0, 128], sizes = [8, 128], strides = [1, 1]} : vector<8x256xf32> to vector<8x128xf32>
    %cst_26 = arith.constant 0.000000e+00 : f32
    %35 = vector.broadcast %cst_26 : f32 to vector<8x128xf32>
    %36 = arith.subf %35, %34 : vector<8x128xf32>
    %37 = math.exp %36 : vector<8x128xf32>
    %cst_27 = arith.constant 1.000000e+00 : f32
    %38 = vector.broadcast %cst_27 : f32 to vector<8x128xf32>
    %39 = arith.addf %38, %37 : vector<8x128xf32>
    %cst_28 = arith.constant 1.000000e+00 : f32
    %40 = vector.broadcast %cst_28 : f32 to vector<8x128xf32>
    %41 = arith.divf %40, %39 : vector<8x128xf32>
    %42 = arith.subf %0, %33 : vector<8x128xf32>
    %43 = arith.mulf %41, %42 : vector<8x128xf32>
    %44 = arith.addf %33, %43 : vector<8x128xf32>
    %45 = vector.broadcast %3 : vector<1x128xf32> to vector<8x128xf32>
    %46 = arith.mulf %45, %44 : vector<8x128xf32>
    %47 = vector.broadcast %1 : vector<1x128xf32> to vector<8x128xf32>
    %48 = arith.mulf %47, %0 : vector<8x128xf32>
    %49 = arith.addf %46, %48 : vector<8x128xf32>
    %c0_29 = arith.constant 0 : index
    %c0_30 = arith.constant 0 : index
    %50 = vector.load %arg10[%c0_29, %c0_30] : memref<8x128xf32, #tpu.memory_space<vmem>>, vector<8x128xf32>
    tpu.vector_store %arg10[%c0_29, %c0_30], %49 {strides = array<i32>} : memref<8x128xf32, #tpu.memory_space<vmem>>, vector<8x128xf32>,
    %51 = math.log1p %37 : vector<8x128xf32>
    %cst_31 = arith.constant 0.000000e+00 : f32
    %52 = vector.broadcast %cst_31 : f32 to vector<8x128xf32>
    %53 = arith.subf %52, %51 : vector<8x128xf32>
    %54 = vector.broadcast %3 : vector<1x128xf32> to vector<8x128xf32>
    %55 = arith.mulf %54, %53 : vector<8x128xf32>
    %c0_32 = arith.constant 0 : index
    %c0_33 = arith.constant 0 : index
    %56 = vector.load %arg9[%c0_32, %c0_33] : memref<128x8xf32, #tpu.memory_space<vmem>>, vector<128x8xf32>
    %cst_34 = arith.constant dense<0.000000e+00> : vector<8x8xf32>
    %57 = tpu.matmul %55, %56, %cst_34 {dimension_numbers = #tpu.dot_dimension_numbers<[1], [0], [0], [1], [0, 0, 1, 1], [], []>} : vector<8x128xf32>, vector<128x8xf32>, vector<8x8xf32> -> vector<8x8xf32>
    %c0_35 = arith.constant 0 : index
    %c0_36 = arith.constant 0 : index
    %58 = vector.load %arg11[%c0_35, %c0_36] : memref<8x8xf32, #tpu.memory_space<vmem>>, vector<8x8xf32>
    tpu.vector_store %arg11[%c0_35, %c0_36], %57 {strides = array<i32>} : memref<8x8xf32, #tpu.memory_space<vmem>>, vector<8x8xf32>,
    return
  }
  func.func @transform_0(%arg0: i32) -> (i32, i32) {
    %c0_i32 = arith.constant 0 : i32
    %c0_i32_0 = arith.constant 0 : i32
    return %arg0, %c0_i32 : i32, i32
  }
  func.func @transform_1(%arg0: i32) -> (i32, i32) {
    %c0_i32 = arith.constant 0 : i32
    %c0_i32_0 = arith.constant 0 : i32
    %c0_i32_1 = arith.constant 0 : i32
    return %c0_i32, %c0_i32_0 : i32, i32
  }
  func.func @transform_2(%arg0: i32) -> (i32, i32) {
    %c0_i32 = arith.constant 0 : i32
    %c0_i32_0 = arith.constant 0 : i32
    %c0_i32_1 = arith.constant 0 : i32
    return %c0_i32, %c0_i32_0 : i32, i32
  }
  func.func @transform_3(%arg0: i32) -> (i32, i32) {
    %c0_i32 = arith.constant 0 : i32
    %c0_i32_0 = arith.constant 0 : i32
    %c0_i32_1 = arith.constant 0 : i32
    return %c0_i32, %c0_i32_0 : i32, i32
  }
  func.func @transform_4(%arg0: i32) -> (i32, i32, i32) {
    %c0_i32 = arith.constant 0 : i32
    %c0_i32_0 = arith.constant 0 : i32
    %c0_i32_1 = arith.constant 0 : i32
    %c0_i32_2 = arith.constant 0 : i32
    return %c0_i32, %c0_i32_0, %c0_i32_1 : i32, i32, i32
  }
  func.func @transform_5(%arg0: i32) -> (i32, i32, i32) {
    %c0_i32 = arith.constant 0 : i32
    %c0_i32_0 = arith.constant 0 : i32
    %c0_i32_1 = arith.constant 0 : i32
    %c0_i32_2 = arith.constant 0 : i32
    return %c0_i32, %c0_i32_0, %c0_i32_1 : i32, i32, i32
  }
  func.func @transform_6(%arg0: i32) -> (i32, i32) {
    %c0_i32 = arith.constant 0 : i32
    %c0_i32_0 = arith.constant 0 : i32
    %c0_i32_1 = arith.constant 0 : i32
    return %c0_i32, %c0_i32_0 : i32, i32
  }
  func.func @transform_7(%arg0: i32) -> (i32, i32) {
    %c0_i32 = arith.constant 0 : i32
    %c0_i32_0 = arith.constant 0 : i32
    %c0_i32_1 = arith.constant 0 : i32
    return %c0_i32, %c0_i32_0 : i32, i32
  }
  func.func @transform_8(%arg0: i32) -> (i32, i32) {
    %c0_i32 = arith.constant 0 : i32
    %c0_i32_0 = arith.constant 0 : i32
    %c0_i32_1 = arith.constant 0 : i32
    return %c0_i32, %c0_i32_0 : i32, i32
  }
  func.func @transform_9(%arg0: i32) -> (i32, i32) {
    %c0_i32 = arith.constant 0 : i32
    %c0_i32_0 = arith.constant 0 : i32
    return %arg0, %c0_i32 : i32, i32
  }
  func.func @transform_10(%arg0: i32) -> (i32, i32) {
    %c0_i32 = arith.constant 0 : i32
    %c0_i32_0 = arith.constant 0 : i32
    return %arg0, %c0_i32 : i32, i32
  }
}

</mosaic_0001>

<bundles_post_ra>
// kernel: tpu_custom_call.1
= control target key start
LH: loop header
LB: loop body
LE: loop exit
PB: predicated region body
PF: predicated region fallthrough
CT: control target
= control target key end

     0   :  { %16 = vsyncpa [#allocation3], 0  ;;  %s1179_s0 = inlined_call_operand.vmem [shape: f32[8,128], index: 0, kind: input, shape index: {}]   ;;  %s1180_s1 = inlined_call_operand.vmem [shape: f32[1,128], index: 1, kind: input, shape index: {}]   ;;  %s1181_s2 = inlined_call_operand.hbm [shape: f32[128,256], index: 2, kind: input, shape index: {}]   ;;  %s1182_s3 = inlined_call_operand.vmem [shape: f32[1,256], index: 3, kind: input, shape index: {}]   ;;  %s1183_s4 = inlined_call_operand.hbm [shape: f32[2,256,256], index: 4, kind: input, shape index: {}]   ;;  %s1184_s5 = inlined_call_operand.vmem [shape: f32[2,1,256], index: 5, kind: input, shape index: {}]   ;;  %s1185_s6 = inlined_call_operand.hbm [shape: f32[256,256], index: 6, kind: input, shape index: {}]   ;;  %s1186_s7 = inlined_call_operand.vmem [shape: f32[1,256], index: 7, kind: input, shape index: {}]   ;;  %s1187_s8 = inlined_call_operand.vmem [shape: f32[128,8], index: 8, kind: input, shape index: {}]   ;;  %s1188_s9 = inlined_call_operand.hbm [shape: f32[8,128], index: 9, kind: output, shape index: {0}]   ;;  %s1189_s10 = inlined_call_operand.hbm [shape: f32[8,8], index: 10, kind: output, shape index: {1}]  }
   0x1   :  { %17 = vsyncpa [#allocation6], 0 }
   0x2   :  { %18 = vsyncpa [#allocation4], 0 }
   0x3   :  { %19 = vsyncpa [#allocation10], 0  ;;  %s986_s13 = smov [#allocation5]   ;;  %s987_s15 = smov [#allocation2]  }
   0x4   :  { %s43_s14 = sshll.u32 %s986_s13, 4  ;;  %s29_s16 = sshll.u32 %s987_s15, 4  ;;  %s44_s14 = int_to_ptr.vmem [resolvable:$true] %s43_s14  ;;  %s30_s16 = int_to_ptr.vmem [resolvable:$true] %s29_s16 }
   0x5   :  { %s886_s17 = scalar_lea.vmem %s44_s14, 16384  ;;  %p891_p1 = scmp.lt.s32.totalorder %s44_s14, %s44_s14 }
   0x6   :  { %p887_p0 = scmp.ne.s32.totalorder %s44_s14, %s886_s17  ;;  %p892_p2 = scmp.lt.s32.totalorder %s886_s17, %s886_s17 }
   0x8   :  { %p893_p3 = por %p892_p2, %p891_p1 }
   0xa   :  { %p894_p4 = pnand %p893_p3, %p887_p0 }
   0xc   :  { %897 = shalt.err (!%p894_p4)
}
   0xd   :  { %s988_s18 = smov 256   ;;  %s989_s19 = smov 16  }
   0xe   :  { %49 = dma.hbm_to_vmem [thread:$0]  %s1183_s4, 16384, %s44_s14, [#allocation6], %s988_s18, %s988_s18, %s989_s19  }
   0xf   :  { %s906_s22 = scalar_lea.vmem %s30_s16, 4096  ;;  %p911_p6 = scmp.lt.s32.totalorder %s30_s16, %s30_s16 }
  0x10   :  { %p907_p5 = scmp.ne.s32.totalorder %s30_s16, %s906_s22  ;;  %p912_p7 = scmp.lt.s32.totalorder %s906_s22, %s906_s22 }
  0x12   :  { %p913_p8 = por %p912_p7, %p911_p6 }
  0x14   :  { %p914_p9 = pnand %p913_p8, %p907_p5 }
  0x16   :  { %917 = shalt.err (!%p914_p9)
}
  0x17   :  { %35 = dma.hbm_to_vmem [thread:$0]  %s1181_s2, 4096, %s30_s16, [#allocation3], %s988_s18, %s988_s18, %s989_s19  }
  0x18   :  { %s990_s25 = smov [#allocation7]  }
  0x19   :  { %s57_s26 = sshll.u32 %s990_s25, 4  ;;  %s58_s26 = int_to_ptr.vmem [resolvable:$true] %s57_s26 }
  0x1a   :  { %s926_s27 = scalar_lea.vmem %s58_s26, 8192  ;;  %p931_p11 = scmp.lt.s32.totalorder %s58_s26, %s58_s26 }
  0x1b   :  { %p927_p10 = scmp.ne.s32.totalorder %s58_s26, %s926_s27  ;;  %p932_p12 = scmp.lt.s32.totalorder %s926_s27, %s926_s27 }
  0x1d   :  { %p933_p13 = por %p932_p12, %p931_p11 }
  0x1f   :  { %p934_p0 = pnand %p933_p13, %p927_p10 }
  0x21   :  { %937 = shalt.err (!%p934_p0)
}
  0x22   :  { %63 = dma.hbm_to_vmem [thread:$0]  %s1185_s6, 8192, %s58_s26, [#allocation6], %s988_s18, %s988_s18, %s989_s19  }
  0x23   :  { %978 = dma.done.wait [#allocation3], 4096  }
  0x24   :  { %979 = vsyncadd [#allocation3], 4294963200 }
  0x25   :  { %980 = dma.done.wait [#allocation6], 24576  }
  0x26   :  { %981 = vsyncadd [#allocation6], 4294942720  ;;  %v991_v0 = vmov 0.0   ;;  %v118_v1 = vld [vmem:[#allocation2 + $0xf8] sm:$0xff]  ;;  %v117_v2 = vld [vmem:[#allocation2 + $0xf0] sm:$0xff]  ;;  %v81_v21 = vlaneseq  ;;  %vm992_vm0 = vmmov 0  }
  0x27   :  { %195 = vmatprep.mubr.f32.mxu0 %v991_v0  ;;  %v116_v3 = vld [vmem:[#allocation2 + $0xe8] sm:$0xff]  ;;  %131 = vmatprep.subr.mxu0 %v118_v1  ;;  %v115_v4 = vld [vmem:[#allocation2 + $0xe0] sm:$0xff]  ;;  %v114_v5 = vld [vmem:[#allocation2 + $0xd8] sm:$0xff] }
  0x28   :  { %132 = vmatpush1.msra.mxu0 %v117_v2  ;;  %v113_v6 = vld [vmem:[#allocation2 + $0xd0] sm:$0xff]  ;;  %v112_v7 = vld [vmem:[#allocation2 + $0xc8] sm:$0xff]  ;;  %v111_v8 = vld [vmem:[#allocation2 + $0xc0] sm:$0xff]  ;;  %v1060_v30 = vshrl.u32 %v81_v21, 7 }
  0x29   :  { %133 = vmatprep.subr.mxu0 %v116_v3  ;;  %v110_v9 = vld [vmem:[#allocation2 + $0xb8] sm:$0xff]  ;;  %v109_v10 = vld [vmem:[#allocation2 + $0xb0] sm:$0xff]  ;;  %v108_v11 = vld [vmem:[#allocation2 + $0xa8] sm:$0xff] }
  0x2a   :  { %134 = vmatpush1.msra.mxu0 %v115_v4  ;;  %v107_v12 = vld [vmem:[#allocation2 + $0xa0] sm:$0xff]  ;;  %v106_v13 = vld [vmem:[#allocation2 + $0x98] sm:$0xff]  ;;  %v105_v14 = vld [vmem:[#allocation2 + $0x90] sm:$0xff]  ;;  %v1063_v39 = vsub.s32 0, %v1060_v30 }
  0x2b   :  { %135 = vmatprep.subr.mxu0 %v114_v5  ;;  %v235_v15 = vld [vmem:[#allocation5 + $0xf8] sm:$0xff]  ;;  %v234_v16 = vld [vmem:[#allocation5 + $0xf0] sm:$0xff]  ;;  %v104_v17 = vld [vmem:[#allocation2 + $0x88] sm:$0xff] }
  0x2c   :  { %136 = vmatpush1.msra.mxu0 %v113_v6  ;;  %280 = vmatprep.subr.mxu1 %v235_v15  ;;  %v233_v18 = vld [vmem:[#allocation5 + $0xe8] sm:$0xff]  ;;  %v232_v19 = vld [vmem:[#allocation5 + $0xe0] sm:$0xff]  ;;  %v231_v22 = vld [vmem:[#allocation5 + $0xd8] sm:$0xff] }
  0x2d   :  { %137 = vmatprep.subr.mxu0 %v112_v7  ;;  %v103_v20 = vld [vmem:[#allocation2 + $0x80] sm:$0xff]  ;;  %281 = vmatpush1.msra.mxu1 %v234_v16  ;;  %v102_v23 = vld [vmem:[#allocation2 + $0x78] sm:$0xff]  ;;  %v230_v24 = vld [vmem:[#allocation5 + $0xd0] sm:$0xff] }
  0x2e   :  { %138 = vmatpush1.msra.mxu0 %v111_v8  ;;  %282 = vmatprep.subr.mxu1 %v233_v18  ;;  %v101_v25 = vld [vmem:[#allocation2 + $0x70] sm:$0xff]  ;;  %v229_v26 = vld [vmem:[#allocation5 + $0xc8] sm:$0xff]  ;;  %v228_v28 = vld [vmem:[#allocation5 + $0xc0] sm:$0xff] }
  0x2f   :  { %139 = vmatprep.subr.mxu0 %v110_v9  ;;  %283 = vmatpush1.msra.mxu1 %v232_v19  ;;  %v100_v27 = vld [vmem:[#allocation2 + $0x68] sm:$0xff]  ;;  %v99_v29 = vld [vmem:[#allocation2 + $0x60] sm:$0xff]  ;;  %v227_v31 = vld [vmem:[#allocation5 + $0xb8] sm:$0xff] }
  0x30   :  { %140 = vmatpush1.msra.mxu0 %v109_v10  ;;  %284 = vmatprep.subr.mxu1 %v231_v22  ;;  %v98_v32 = vld [vmem:[#allocation2 + $0x58] sm:$0xff]  ;;  %v226_v33 = vld [vmem:[#allocation5 + $0xb0] sm:$0xff]  ;;  %v225_v35 = vld [vmem:[#allocation5 + $0xa8] sm:$0xff] }
  0x31   :  { %141 = vmatprep.subr.mxu0 %v108_v11  ;;  %285 = vmatpush1.msra.mxu1 %v230_v24  ;;  %v97_v34 = vld [vmem:[#allocation2 + $0x50] sm:$0xff]  ;;  %v96_v36 = vld [vmem:[#allocation2 + $0x48] sm:$0xff]  ;;  %v224_v37 = vld [vmem:[#allocation5 + $0xa0] sm:$0xff] }
  0x32   :  { %142 = vmatpush1.msra.mxu0 %v107_v12  ;;  %286 = vmatprep.subr.mxu1 %v229_v26  ;;  %v95_v38 = vld [vmem:[#allocation2 + $0x40] sm:$0xff]  ;;  %v223_v40 = vld [vmem:[#allocation5 + $0x98] sm:$0xff]  ;;  %v222_v43 = vld [vmem:[#allocation5 + $0x90] sm:$0xff] }
  0x33   :  { %143 = vmatprep.subr.mxu0 %v106_v13  ;;  %287 = vmatpush1.msra.mxu1 %v228_v28  ;;  %v94_v41 = vld [vmem:[#allocation2 + $0x38] sm:$0xff]  ;;  %v1068_v42 = vld [vmem:[%s1180_s1] sm:$0x1]  ;;  %v93_v44 = vld [vmem:[#allocation2 + $0x30] sm:$0xff] }
  0x34   :  { %144 = vmatpush1.msra.mxu0 %v105_v14  ;;  %288 = vmatprep.subr.mxu1 %v227_v31  ;;  %v221_v45 = vld [vmem:[#allocation5 + $0x88] sm:$0xff]  ;;  %v220_v47 = vld [vmem:[#allocation5 + $0x80] sm:$0xff]  ;;  %v84_v49 = vrot.slane %v1068_v42, %v1063_v39  ;;  %v219_v50 = vld [vmem:[#allocation5 + $0x78] sm:$0xff] }
  0x35   :  { %145 = vmatprep.subr.mxu0 %v104_v17  ;;  %289 = vmatpush1.msra.mxu1 %v226_v33  ;;  %v92_v46 = vld [vmem:[#allocation2 + $0x28] sm:$0xff]  ;;  %v91_v48 = vld [vmem:[#allocation2 + $0x20] sm:$0xff]  ;;  %v90_v51 = vld [vmem:[#allocation2 + $0x18] sm:$0xff] }
  0x36   :  { %146 = vmatpush1.msra.mxu0 %v103_v20  ;;  %290 = vmatprep.subr.mxu1 %v225_v35  ;;  %v1075_v52 = vld [vmem:[%s1179_s0] sm:$0xff]  ;;  %v218_v53 = vld [vmem:[#allocation5 + $0x70] sm:$0xff]  ;;  %v217_v55 = vld [vmem:[#allocation5 + $0x68] sm:$0xff] }
  0x37   :  { %147 = vmatprep.subr.mxu0 %v102_v23  ;;  %291 = vmatpush1.msra.mxu1 %v224_v37  ;;  %v89_v54 = vld [vmem:[#allocation2 + $0x10] sm:$0xff]  ;;  %v88_v56 = vld [vmem:[#allocation2 + $0x8] sm:$0xff]  ;;  %v216_v57 = vld [vmem:[#allocation5 + $0x60] sm:$0xff]  ;;  %v1078_v59 = vmul.f32 %v84_v49, %v1075_v52 }
  0x38   :  { %148 = vmatpush1.msra.mxu0 %v101_v25  ;;  %292 = vmatprep.subr.mxu1 %v223_v40  ;;  %v87_v58 = vld [vmem:[#allocation2] sm:$0xff]  ;;  %v215_v60 = vld [vmem:[#allocation5 + $0x58] sm:$0xff]  ;;  %v214_v61 = vld [vmem:[#allocation5 + $0x50] sm:$0xff] }
  0x39   :  { %149 = vmatprep.subr.mxu0 %v100_v27  ;;  %293 = vmatpush1.msra.mxu1 %v222_v43  ;;  %v213_v62 = vld [vmem:[#allocation5 + $0x48] sm:$0xff]  ;;  %v212_v63 = vld [vmem:[#allocation5 + $0x40] sm:$0xff]  ;;  %v211_v1 = vld [vmem:[#allocation5 + $0x38] sm:$0xff] }
  0x3a   :  { %150 = vmatpush1.msra.mxu0 %v99_v29  ;;  %294 = vmatprep.subr.mxu1 %v221_v45  ;;  %v210_v2 = vld [vmem:[#allocation5 + $0x30] sm:$0xff]  ;;  %v209_v3 = vld [vmem:[#allocation5 + $0x28] sm:$0xff]  ;;  %v208_v4 = vld [vmem:[#allocation5 + $0x20] sm:$0xff] }
  0x3b   :  { %151 = vmatprep.subr.mxu0 %v98_v32  ;;  %295 = vmatpush1.msra.mxu1 %v220_v47  ;;  %v207_v5 = vld [vmem:[#allocation5 + $0x18] sm:$0xff]  ;;  %v206_v6 = vld [vmem:[#allocation5 + $0x10] sm:$0xff]  ;;  %v205_v7 = vld [vmem:[#allocation5 + $0x8] sm:$0xff] }
  0x3c   :  { %152 = vmatpush1.msra.mxu0 %v97_v34  ;;  %296 = vmatprep.subr.mxu1 %v219_v50  ;;  %v204_v8 = vld [vmem:[#allocation5] sm:$0xff]  ;;  %v267_v9 = vld [vmem:[#allocation5 + $0x1f8] sm:$0xff]  ;;  %v266_v10 = vld [vmem:[#allocation5 + $0x1f0] sm:$0xff] }
  0x3d   :  { %153 = vmatprep.subr.mxu0 %v96_v36  ;;  %297 = vmatpush1.msra.mxu1 %v218_v53  ;;  %v265_v11 = vld [vmem:[#allocation5 + $0x1e8] sm:$0xff]  ;;  %v264_v12 = vld [vmem:[#allocation5 + $0x1e0] sm:$0xff]  ;;  %v263_v13 = vld [vmem:[#allocation5 + $0x1d8] sm:$0xff] }
  0x3e   :  { %154 = vmatpush1.msra.mxu0 %v95_v38  ;;  %298 = vmatprep.subr.mxu1 %v217_v55  ;;  %v262_v14 = vld [vmem:[#allocation5 + $0x1d0] sm:$0xff]  ;;  %v261_v15 = vld [vmem:[#allocation5 + $0x1c8] sm:$0xff]  ;;  %v260_v16 = vld [vmem:[#allocation5 + $0x1c0] sm:$0xff] }
  0x3f   :  { %155 = vmatprep.subr.mxu0 %v94_v41  ;;  %299 = vmatpush1.msra.mxu1 %v216_v57  ;;  %v259_v17 = vld [vmem:[#allocation5 + $0x1b8] sm:$0xff]  ;;  %v258_v18 = vld [vmem:[#allocation5 + $0x1b0] sm:$0xff]  ;;  %v257_v19 = vld [vmem:[#allocation5 + $0x1a8] sm:$0xff] }
  0x40   :  { %156 = vmatpush1.msra.mxu0 %v93_v44  ;;  %300 = vmatprep.subr.mxu1 %v215_v60  ;;  %v256_v20 = vld [vmem:[#allocation5 + $0x1a0] sm:$0xff]  ;;  %v255_v21 = vld [vmem:[#allocation5 + $0x198] sm:$0xff]  ;;  %v254_v22 = vld [vmem:[#allocation5 + $0x190] sm:$0xff] }
  0x41   :  { %157 = vmatprep.subr.mxu0 %v92_v46  ;;  %301 = vmatpush1.msra.mxu1 %v214_v61  ;;  %v253_v23 = vld [vmem:[#allocation5 + $0x188] sm:$0xff]  ;;  %v252_v24 = vld [vmem:[#allocation5 + $0x180] sm:$0xff]  ;;  %v251_v25 = vld [vmem:[#allocation5 + $0x178] sm:$0xff] }
  0x42   :  { %158 = vmatpush1.msra.mxu0 %v91_v48  ;;  %302 = vmatprep.subr.mxu1 %v213_v62  ;;  %v250_v26 = vld [vmem:[#allocation5 + $0x170] sm:$0xff]  ;;  %v249_v27 = vld [vmem:[#allocation5 + $0x168] sm:$0xff]  ;;  %v248_v28 = vld [vmem:[#allocation5 + $0x160] sm:$0xff] }
  0x43   :  { %159 = vmatprep.subr.mxu0 %v90_v51  ;;  %303 = vmatpush1.msra.mxu1 %v212_v63  ;;  %v247_v29 = vld [vmem:[#allocation5 + $0x158] sm:$0xff]  ;;  %v246_v31 = vld [vmem:[#allocation5 + $0x150] sm:$0xff]  ;;  %v245_v32 = vld [vmem:[#allocation5 + $0x148] sm:$0xff] }
  0x44   :  { %160 = vmatpush1.msra.mxu0 %v89_v54  ;;  %304 = vmatprep.subr.mxu1 %v211_v1  ;;  %v244_v33 = vld [vmem:[#allocation5 + $0x140] sm:$0xff]  ;;  %v243_v34 = vld [vmem:[#allocation5 + $0x138] sm:$0xff]  ;;  %v242_v35 = vld [vmem:[#allocation5 + $0x130] sm:$0xff] }
  0x45   :  { %161 = vmatprep.subr.mxu0 %v88_v56  ;;  %305 = vmatpush1.msra.mxu1 %v210_v2  ;;  %v241_v36 = vld [vmem:[#allocation5 + $0x128] sm:$0xff]  ;;  %v240_v37 = vld [vmem:[#allocation5 + $0x120] sm:$0xff]  ;;  %v239_v38 = vld [vmem:[#allocation5 + $0x118] sm:$0xff] }
  0x46   :  { %162 = vmatpush1.msra.mxu0 %v87_v58  ;;  %306 = vmatprep.subr.mxu1 %v209_v3  ;;  %v238_v40 = vld [vmem:[#allocation5 + $0x110] sm:$0xff]  ;;  %v237_v41 = vld [vmem:[#allocation5 + $0x108] sm:$0xff]  ;;  %v236_v43 = vld [vmem:[#allocation5 + $0x100] sm:$0xff] }
  0x47   :  { %196 = vmatmul.mubr.f32.vlgmr.msra.gmra.mxu0 %v1078_v59  ;;  %307 = vmatpush1.msra.mxu1 %v208_v4  ;;  %v385_v44 = vld [vmem:[#allocation5 + $0x2f8] sm:$0xff]  ;;  %v384_v45 = vld [vmem:[#allocation5 + $0x2f0] sm:$0xff]  ;;  %v383_v46 = vld [vmem:[#allocation5 + $0x2e8] sm:$0xff] }
  0x48   :  { %308 = vmatprep.subr.mxu1 %v207_v5  ;;  %431 = vmatprep.subr.mxu0 %v385_v44  ;;  %v382_v47 = vld [vmem:[#allocation5 + $0x2e0] sm:$0xff]  ;;  %v381_v48 = vld [vmem:[#allocation5 + $0x2d8] sm:$0xff]  ;;  %v380_v49 = vld [vmem:[#allocation5 + $0x2d0] sm:$0xff] }
  0x49   :  { %309 = vmatpush1.msra.mxu1 %v206_v6  ;;  %432 = vmatpush1.msra.mxu0 %v384_v45  ;;  %v379_v50 = vld [vmem:[#allocation5 + $0x2c8] sm:$0xff]  ;;  %v378_v51 = vld [vmem:[#allocation5 + $0x2c0] sm:$0xff]  ;;  %v377_v53 = vld [vmem:[#allocation5 + $0x2b8] sm:$0xff] }
  0x4a   :  { %310 = vmatprep.subr.mxu1 %v205_v7  ;;  %433 = vmatprep.subr.mxu0 %v383_v46  ;;  %v376_v54 = vld [vmem:[#allocation5 + $0x2b0] sm:$0xff]  ;;  %v375_v55 = vld [vmem:[#allocation5 + $0x2a8] sm:$0xff]  ;;  %v374_v56 = vld [vmem:[#allocation5 + $0x2a0] sm:$0xff] }
  0x4b   :  { %311 = vmatpush1.msra.mxu1 %v204_v8  ;;  %434 = vmatpush1.msra.mxu0 %v382_v47  ;;  %v373_v57 = vld [vmem:[#allocation5 + $0x298] sm:$0xff]  ;;  %v372_v58 = vld [vmem:[#allocation5 + $0x290] sm:$0xff]  ;;  %v371_v60 = vld [vmem:[#allocation5 + $0x288] sm:$0xff] }
  0x4c   :  { %312 = vmatprep.subr.mxu1 %v267_v9  ;;  %435 = vmatprep.subr.mxu0 %v381_v48  ;;  %v370_v61 = vld [vmem:[#allocation5 + $0x280] sm:$0xff]  ;;  %v369_v62 = vld [vmem:[#allocation5 + $0x278] sm:$0xff]  ;;  %v368_v63 = vld [vmem:[#allocation5 + $0x270] sm:$0xff] }
  0x4d   :  { %313 = vmatpush2.msra.mxu1 %v266_v10  ;;  %436 = vmatpush1.msra.mxu0 %v380_v49  ;;  %v367_v1 = vld [vmem:[#allocation5 + $0x268] sm:$0xff]  ;;  %v366_v2 = vld [vmem:[#allocation5 + $0x260] sm:$0xff]  ;;  %v365_v3 = vld [vmem:[#allocation5 + $0x258] sm:$0xff] }
  0x4e   :  { %314 = vmatprep.subr.mxu1 %v265_v11  ;;  %437 = vmatprep.subr.mxu0 %v379_v50  ;;  %v364_v4 = vld [vmem:[#allocation5 + $0x250] sm:$0xff]  ;;  %v363_v5 = vld [vmem:[#allocation5 + $0x248] sm:$0xff]  ;;  %v362_v6 = vld [vmem:[#allocation5 + $0x240] sm:$0xff] }
  0x4f   :  { %315 = vmatpush2.msra.mxu1 %v264_v12  ;;  %438 = vmatpush1.msra.mxu0 %v378_v51  ;;  %v361_v7 = vld [vmem:[#allocation5 + $0x238] sm:$0xff]  ;;  %v360_v8 = vld [vmem:[#allocation5 + $0x230] sm:$0xff]  ;;  %v359_v9 = vld [vmem:[#allocation5 + $0x228] sm:$0xff] }
  0x50   :  { %316 = vmatprep.subr.mxu1 %v263_v13  ;;  %439 = vmatprep.subr.mxu0 %v377_v53  ;;  %v358_v10 = vld [vmem:[#allocation5 + $0x220] sm:$0xff]  ;;  %v357_v11 = vld [vmem:[#allocation5 + $0x218] sm:$0xff]  ;;  %v356_v12 = vld [vmem:[#allocation5 + $0x210] sm:$0xff] }
  0x51   :  { %317 = vmatpush2.msra.mxu1 %v262_v14  ;;  %440 = vmatpush1.msra.mxu0 %v376_v54  ;;  %v355_v13 = vld [vmem:[#allocation5 + $0x208] sm:$0xff]  ;;  %v354_v14 = vld [vmem:[#allocation5 + $0x200] sm:$0xff]  ;;  %v400_v44 = vld [vmem:[#allocation5 + $0x370] sm:$0xff] }
  0x52   :  { %318 = vmatprep.subr.mxu1 %v261_v15  ;;  %441 = vmatprep.subr.mxu0 %v375_v55  ;;  %v417_v15 = vld [vmem:[#allocation5 + $0x3f8] sm:$0xff]  ;;  %v399_v45 = vld [vmem:[#allocation5 + $0x368] sm:$0xff]  ;;  %v398_v46 = vld [vmem:[#allocation5 + $0x360] sm:$0xff] }
  0x53   :  { %319 = vmatpush2.msra.mxu1 %v260_v16  ;;  %442 = vmatpush1.msra.mxu0 %v374_v56  ;;  %v416_v16 = vld [vmem:[#allocation5 + $0x3f0] sm:$0xff]  ;;  %v397_v47 = vld [vmem:[#allocation5 + $0x358] sm:$0xff]  ;;  %v395_v49 = vld [vmem:[#allocation5 + $0x348] sm:$0xff] }
  0x54   :  { %320 = vmatprep.subr.mxu1 %v259_v17  ;;  %443 = vmatprep.subr.mxu0 %v373_v57  ;;  %v415_v17 = vld [vmem:[#allocation5 + $0x3e8] sm:$0xff]  ;;  %v396_v48 = vld [vmem:[#allocation5 + $0x350] sm:$0xff]  ;;  %v394_v50 = vld [vmem:[#allocation5 + $0x340] sm:$0xff] }
  0x55   :  { %321 = vmatpush2.msra.mxu1 %v258_v18  ;;  %444 = vmatpush1.msra.mxu0 %v372_v58  ;;  %v414_v18 = vld [vmem:[#allocation5 + $0x3e0] sm:$0xff]  ;;  %v393_v51 = vld [vmem:[#allocation5 + $0x338] sm:$0xff]  ;;  %v392_v53 = vld [vmem:[#allocation5 + $0x330] sm:$0xff] }
  0x56   :  { %322 = vmatprep.subr.mxu1 %v257_v19  ;;  %445 = vmatprep.subr.mxu0 %v371_v60  ;;  %v413_v19 = vld [vmem:[#allocation5 + $0x3d8] sm:$0xff]  ;;  %v391_v54 = vld [vmem:[#allocation5 + $0x328] sm:$0xff]  ;;  %v390_v55 = vld [vmem:[#allocation5 + $0x320] sm:$0xff] }
  0x57   :  { %323 = vmatpush2.msra.mxu1 %v256_v20  ;;  %446 = vmatpush1.msra.mxu0 %v370_v61  ;;  %v412_v20 = vld [vmem:[#allocation5 + $0x3d0] sm:$0xff]  ;;  %v389_v56 = vld [vmem:[#allocation5 + $0x318] sm:$0xff]  ;;  %v387_v58 = vld [vmem:[#allocation5 + $0x308] sm:$0xff] }
  0x58   :  { %324 = vmatprep.subr.mxu1 %v255_v21  ;;  %447 = vmatprep.subr.mxu0 %v369_v62  ;;  %v411_v21 = vld [vmem:[#allocation5 + $0x3c8] sm:$0xff]  ;;  %v388_v57 = vld [vmem:[#allocation5 + $0x310] sm:$0xff]  ;;  %v386_v60 = vld [vmem:[#allocation5 + $0x300] sm:$0xff] }
  0x59   :  { %325 = vmatpush2.msra.mxu1 %v254_v22  ;;  %448 = vmatpush1.msra.mxu0 %v368_v63  ;;  %v410_v22 = vld [vmem:[#allocation5 + $0x3c0] sm:$0xff]  ;;  %v535_v61 = vld [vmem:[#allocation7 + $0xf8] sm:$0xff]  ;;  %v534_v62 = vld [vmem:[#allocation7 + $0xf0] sm:$0xff] }
  0x5a   :  { %326 = vmatprep.subr.mxu1 %v253_v23  ;;  %449 = vmatprep.subr.mxu0 %v367_v1  ;;  %v409_v23 = vld [vmem:[#allocation5 + $0x3b8] sm:$0xff]  ;;  %v533_v63 = vld [vmem:[#allocation7 + $0xe8] sm:$0xff]  ;;  %v532_v1 = vld [vmem:[#allocation7 + $0xe0] sm:$0xff] }
  0x5b   :  { %327 = vmatpush2.msra.mxu1 %v252_v24  ;;  %450 = vmatpush1.msra.mxu0 %v366_v2  ;;  %v408_v24 = vld [vmem:[#allocation5 + $0x3b0] sm:$0xff]  ;;  %v531_v2 = vld [vmem:[#allocation7 + $0xd8] sm:$0xff] }
  0x5c   :  { %328 = vmatprep.subr.mxu1 %v251_v25  ;;  %451 = vmatprep.subr.mxu0 %v365_v3  ;;  %v407_v25 = vld [vmem:[#allocation5 + $0x3a8] sm:$0xff]  ;;  %v530_v3 = vld [vmem:[#allocation7 + $0xd0] sm:$0xff] }
  0x5d   :  { %329 = vmatpush2.msra.mxu1 %v250_v26  ;;  %452 = vmatpush1.msra.mxu0 %v364_v4  ;;  %v406_v26 = vld [vmem:[#allocation5 + $0x3a0] sm:$0xff]  ;;  %v529_v4 = vld [vmem:[#allocation7 + $0xc8] sm:$0xff] }
  0x5e   :  { %330 = vmatprep.subr.mxu1 %v249_v27  ;;  %453 = vmatprep.subr.mxu0 %v363_v5  ;;  %v119_v27 = vld [vmem:[%s1182_s3] sm:$0x3] }
  0x5f   :  { %331 = vmatpush2.msra.mxu1 %v248_v28  ;;  %454 = vmatpush1.msra.mxu0 %v362_v6  ;;  %v1085_v28 = vsub.s32 1, %v1060_v30  ;;  %v403_v30 = vld [vmem:[#allocation5 + $0x388] sm:$0xff]  ;;  %v528_v5 = vld [vmem:[#allocation7 + $0xc0] sm:$0xff]  ;;  %v527_v6 = vld [vmem:[#allocation7 + $0xb8] sm:$0xff] }
  0x60   :  { %332 = vmatprep.subr.mxu1 %v247_v29  ;;  %455 = vmatprep.subr.mxu0 %v361_v7  ;;  %v124_v29 = vrot.slane %v119_v27, %v1063_v39  ;;  %v526_v7 = vld [vmem:[#allocation7 + $0xb0] sm:$0xff] }
  0x61   :  { %333 = vmatpush2.msra.mxu1 %v246_v31  ;;  %456 = vmatpush1.msra.mxu0 %v360_v8  ;;  %v128_v31 = vrot.slane %v119_v27, %v1085_v28  ;;  %v525_v8 = vld [vmem:[#allocation7 + $0xa8] sm:$0xff]  ;;  %v506_v27 = vld [vmem:[#allocation7 + $0x10] sm:$0xff] }
  0x62   :  { %334 = vmatprep.subr.mxu1 %v245_v32  ;;  %457 = vmatprep.subr.mxu0 %v359_v9  ;;  %v524_v9 = vld [vmem:[#allocation7 + $0xa0] sm:$0xff] }
  0x63   :  { %335 = vmatpush2.msra.mxu1 %v244_v33  ;;  %458 = vmatpush1.msra.mxu0 %v358_v10  ;;  %v523_v10 = vld [vmem:[#allocation7 + $0x98] sm:$0xff] }
  0x64   :  { %336 = vmatprep.subr.mxu1 %v243_v34  ;;  %459 = vmatprep.subr.mxu0 %v357_v11  ;;  %v522_v11 = vld [vmem:[#allocation7 + $0x90] sm:$0xff] }
  0x65   :  { %337 = vmatpush2.msra.mxu1 %v242_v35  ;;  %460 = vmatpush1.msra.mxu0 %v356_v12  ;;  %v521_v12 = vld [vmem:[#allocation7 + $0x88] sm:$0xff] }
  0x66   :  { %338 = vmatprep.subr.mxu1 %v241_v36  ;;  %461 = vmatprep.subr.mxu0 %v355_v13  ;;  %v520_v13 = vld [vmem:[#allocation7 + $0x80] sm:$0xff] }
  0x67   :  { %339 = vmatpush2.msra.mxu1 %v240_v37  ;;  %462 = vmatpush1.msra.mxu0 %v354_v14  ;;  %v519_v14 = vld [vmem:[#allocation7 + $0x78] sm:$0xff] }
  0x68   :  { %340 = vmatprep.subr.mxu1 %v239_v38  ;;  %463 = vmatprep.subr.mxu0 %v417_v15  ;;  %v405_v38 = vld [vmem:[#allocation5 + $0x398] sm:$0xff]  ;;  %v518_v15 = vld [vmem:[#allocation7 + $0x70] sm:$0xff] }
  0x69   :  { %341 = vmatpush2.msra.mxu1 %v238_v40  ;;  %464 = vmatpush2.msra.mxu0 %v416_v16  ;;  %v404_v40 = vld [vmem:[#allocation5 + $0x390] sm:$0xff]  ;;  %v517_v16 = vld [vmem:[#allocation7 + $0x68] sm:$0xff] }
  0x6a   :  { %342 = vmatprep.subr.mxu1 %v237_v41  ;;  %465 = vmatprep.subr.mxu0 %v415_v17  ;;  %v402_v41 = vld [vmem:[#allocation5 + $0x380] sm:$0xff] }
  0x6b   :  { %343 = vmatpush2.msra.mxu1 %v236_v43  ;;  %466 = vmatpush2.msra.mxu0 %v414_v18  ;;  %v401_v43 = vld [vmem:[#allocation5 + $0x378] sm:$0xff]  ;;  %v516_v17 = vld [vmem:[#allocation7 + $0x60] sm:$0xff] }
  0x6c   :  { %467 = vmatprep.subr.mxu0 %v413_v19  ;;  %580 = vmatprep.subr.mxu1 %v535_v61  ;;  %v515_v18 = vld [vmem:[#allocation7 + $0x58] sm:$0xff]  ;;  %v514_v19 = vld [vmem:[#allocation7 + $0x50] sm:$0xff] }
  0x6d   :  { %468 = vmatpush2.msra.mxu0 %v412_v20  ;;  %v513_v20 = vld [vmem:[#allocation7 + $0x48] sm:$0xff]  ;;  %v550_v61 = vld [vmem:[#allocation7 + $0x170] sm:$0xff] }
  0x6e   :  { %469 = vmatprep.subr.mxu0 %v411_v21  ;;  %v512_v21 = vld [vmem:[#allocation7 + $0x40] sm:$0xff] }
  0x6f   :  { %470 = vmatpush2.msra.mxu0 %v410_v22  ;;  %v511_v22 = vld [vmem:[#allocation7 + $0x38] sm:$0xff] }
  0x70   :  { %471 = vmatprep.subr.mxu0 %v409_v23  ;;  %v510_v23 = vld [vmem:[#allocation7 + $0x30] sm:$0xff] }
  0x71   :  { %472 = vmatpush2.msra.mxu0 %v408_v24  ;;  %v509_v24 = vld [vmem:[#allocation7 + $0x28] sm:$0xff] }
  0x72   :  { %473 = vmatprep.subr.mxu0 %v407_v25  ;;  %v508_v25 = vld [vmem:[#allocation7 + $0x20] sm:$0xff] }
  0x73   :  { %474 = vmatpush2.msra.mxu0 %v406_v26  ;;  %v507_v26 = vld [vmem:[#allocation7 + $0x18] sm:$0xff] }
  0x74   :  { %475 = vmatprep.subr.mxu0 %v405_v38  ;;  %v561_v38 = vld [vmem:[#allocation7 + $0x1c8] sm:$0xff] }
  0x75   :  { %476 = vmatpush2.msra.mxu0 %v404_v40  ;;  %v560_v40 = vld [vmem:[#allocation7 + $0x1c0] sm:$0xff] }
  0x76   :  { %477 = vmatprep.subr.mxu0 %v403_v30  ;;  %v559_v30 = vld [vmem:[#allocation7 + $0x1b8] sm:$0xff] }
  0x77   :  { %478 = vmatpush2.msra.mxu0 %v402_v41  ;;  %v558_v41 = vld [vmem:[#allocation7 + $0x1b0] sm:$0xff] }
  0x78   :  { %479 = vmatprep.subr.mxu0 %v401_v43  ;;  %v557_v43 = vld [vmem:[#allocation7 + $0x1a8] sm:$0xff] }
  0x79   :  { %480 = vmatpush2.msra.mxu0 %v400_v44  ;;  %v556_v44 = vld [vmem:[#allocation7 + $0x1a0] sm:$0xff] }
  0x7a   :  { %481 = vmatprep.subr.mxu0 %v399_v45  ;;  %v268_v45 = vld [vmem:[%s1184_s5] sm:$0x3] }
  0x7b   :  { %482 = vmatpush2.msra.mxu0 %v398_v46  ;;  %v273_v46 = vrot.slane %v268_v45, %v1063_v39 }
  0x7c   :  { %483 = vmatprep.subr.mxu0 %v397_v47  ;;  %v277_v47 = vrot.slane %v268_v45, %v1085_v28 }
  0x7d   :  { %484 = vmatpush2.msra.mxu0 %v396_v48 }
  0x7e   :  { %485 = vmatprep.subr.mxu0 %v395_v49 }
  0x7f   :  { %486 = vmatpush2.msra.mxu0 %v394_v50 }
  0x80   :  { %487 = vmatprep.subr.mxu0 %v393_v51 }
  0x81   :  { %488 = vmatpush2.msra.mxu0 %v392_v53 }
  0x82   :  { %489 = vmatprep.subr.mxu0 %v391_v54 }
  0x83   :  { %490 = vmatpush2.msra.mxu0 %v390_v55  ;;  %v555_v55 = vld [vmem:[#allocation7 + $0x198] sm:$0xff] }
  0x84   :  { %491 = vmatprep.subr.mxu0 %v389_v56  ;;  %v554_v56 = vld [vmem:[#allocation7 + $0x190] sm:$0xff] }
  0x85   :  { %492 = vmatpush2.msra.mxu0 %v388_v57  ;;  %v553_v57 = vld [vmem:[#allocation7 + $0x188] sm:$0xff] }
  0x86   :  { %493 = vmatprep.subr.mxu0 %v387_v58  ;;  %v552_v58 = vld [vmem:[#allocation7 + $0x180] sm:$0xff] }
  0x87   :  { %494 = vmatpush2.msra.mxu0 %v386_v60  ;;  %v551_v60 = vld [vmem:[#allocation7 + $0x178] sm:$0xff] }
  0x88   :  { %816 = vmatprep.subr.mxu0 %v991_v0 }
 0x107   :  { %v197_v32 = vpop.f32.mrf.mxu0 }
 0x108   :  { %v198_v33 = vadd.f32 %v197_v32, %v124_v29  ;;  %v505_v29 = vld [vmem:[#allocation7 + $0x8] sm:$0xff]  ;;  %v567_v32 = vld [vmem:[#allocation7 + $0x1f8] sm:$0xff] }
 0x109   :  { %v199_v34 = vpop.f32.mrf.mxu0 }
 0x10a   :  { %v200_v35 = vadd.f32 %v199_v34, %v128_v31  ;;  %v504_v31 = vld [vmem:[#allocation7] sm:$0xff]  ;;  %v565_v34 = vld [vmem:[#allocation7 + $0x1e8] sm:$0xff] }
 0x10c   :  { %860 = vtanh.f32 %v200_v35  ;;  %v564_v35 = vld [vmem:[#allocation7 + $0x1e0] sm:$0xff] }
 0x10d   :  { %862 = vtanh.f32 %v198_v33  ;;  %v566_v33 = vld [vmem:[#allocation7 + $0x1f0] sm:$0xff] }
 0x119   :  { %v861_v36 = vpop.eup %860 }
 0x11a   :  { %v863_v37 = vpop.eup %862  ;;  %344 = vmatprep.mubr.f32.mxu1 %v861_v36  ;;  %v563_v36 = vld [vmem:[#allocation7 + $0x1d8] sm:$0xff] }
 0x11b   :  { %345 = vmatmul.mubr.f32.vlgmr.msra.gmra.mxu1 %v863_v37  ;;  %v562_v37 = vld [vmem:[#allocation7 + $0x1d0] sm:$0xff] }
 0x11c   :  { %581 = vmatpush1.msra.mxu1 %v534_v62  ;;  %v549_v62 = vld [vmem:[#allocation7 + $0x168] sm:$0xff] }
 0x11d   :  { %582 = vmatprep.subr.mxu1 %v533_v63  ;;  %v548_v63 = vld [vmem:[#allocation7 + $0x160] sm:$0xff] }
 0x11e   :  { %583 = vmatpush1.msra.mxu1 %v532_v1  ;;  %v547_v1 = vld [vmem:[#allocation7 + $0x158] sm:$0xff] }
 0x11f   :  { %584 = vmatprep.subr.mxu1 %v531_v2  ;;  %v546_v2 = vld [vmem:[#allocation7 + $0x150] sm:$0xff] }
 0x120   :  { %585 = vmatpush1.msra.mxu1 %v530_v3  ;;  %v545_v3 = vld [vmem:[#allocation7 + $0x148] sm:$0xff] }
 0x121   :  { %586 = vmatprep.subr.mxu1 %v529_v4  ;;  %v544_v4 = vld [vmem:[#allocation7 + $0x140] sm:$0xff] }
 0x122   :  { %587 = vmatpush1.msra.mxu1 %v528_v5  ;;  %v543_v5 = vld [vmem:[#allocation7 + $0x138] sm:$0xff] }
 0x123   :  { %588 = vmatprep.subr.mxu1 %v527_v6  ;;  %v542_v6 = vld [vmem:[#allocation7 + $0x130] sm:$0xff] }
 0x124   :  { %589 = vmatpush1.msra.mxu1 %v526_v7  ;;  %v541_v7 = vld [vmem:[#allocation7 + $0x128] sm:$0xff] }
 0x125   :  { %590 = vmatprep.subr.mxu1 %v525_v8  ;;  %v540_v8 = vld [vmem:[#allocation7 + $0x120] sm:$0xff] }
 0x126   :  { %591 = vmatpush1.msra.mxu1 %v524_v9  ;;  %v539_v9 = vld [vmem:[#allocation7 + $0x118] sm:$0xff] }
 0x127   :  { %592 = vmatprep.subr.mxu1 %v523_v10  ;;  %v538_v10 = vld [vmem:[#allocation7 + $0x110] sm:$0xff] }
 0x128   :  { %593 = vmatpush1.msra.mxu1 %v522_v11  ;;  %v537_v11 = vld [vmem:[#allocation7 + $0x108] sm:$0xff] }
 0x129   :  { %594 = vmatprep.subr.mxu1 %v521_v12  ;;  %v536_v12 = vld [vmem:[#allocation7 + $0x100] sm:$0xff] }
 0x12a   :  { %595 = vmatpush1.msra.mxu1 %v520_v13  ;;  %v798_v13 = vld [vmem:[%s1184_s5 + $0x2] sm:$0x3] }
 0x12b   :  { %596 = vmatprep.subr.mxu1 %v519_v14  ;;  %v424_v14 = vrot.slane %v798_v13, %v1063_v39 }
 0x12c   :  { %597 = vmatpush1.msra.mxu1 %v518_v15  ;;  %v428_v15 = vrot.slane %v798_v13, %v1085_v28 }
 0x12d   :  { %598 = vmatprep.subr.mxu1 %v517_v16 }
 0x12e   :  { %599 = vmatpush1.msra.mxu1 %v516_v17 }
 0x12f   :  { %600 = vmatprep.subr.mxu1 %v515_v18 }
 0x130   :  { %601 = vmatpush1.msra.mxu1 %v514_v19 }
 0x131   :  { %602 = vmatprep.subr.mxu1 %v513_v20 }
 0x132   :  { %603 = vmatpush1.msra.mxu1 %v512_v21 }
 0x133   :  { %604 = vmatprep.subr.mxu1 %v511_v22  ;;  %v695_v22 = vld [vmem:[%s1187_s8 + $0x78] sm:$0xff] }
 0x134   :  { %605 = vmatpush1.msra.mxu1 %v510_v23  ;;  %v694_v23 = vld [vmem:[%s1187_s8 + $0x70] sm:$0xff] }
 0x135   :  { %606 = vmatprep.subr.mxu1 %v509_v24  ;;  %v693_v24 = vld [vmem:[%s1187_s8 + $0x68] sm:$0xff] }
 0x136   :  { %607 = vmatpush1.msra.mxu1 %v508_v25  ;;  %v692_v25 = vld [vmem:[%s1187_s8 + $0x60] sm:$0xff] }
 0x137   :  { %608 = vmatprep.subr.mxu1 %v507_v26  ;;  %v691_v26 = vld [vmem:[%s1187_s8 + $0x58] sm:$0xff] }
 0x138   :  { %609 = vmatpush1.msra.mxu1 %v506_v27  ;;  %v690_v27 = vld [vmem:[%s1187_s8 + $0x50] sm:$0xff] }
 0x139   :  { %610 = vmatprep.subr.mxu1 %v505_v29  ;;  %v689_v29 = vld [vmem:[%s1187_s8 + $0x48] sm:$0xff] }
 0x13a   :  { %611 = vmatpush1.msra.mxu1 %v504_v31  ;;  %v688_v31 = vld [vmem:[%s1187_s8 + $0x40] sm:$0xff] }
 0x13b   :  { %612 = vmatprep.subr.mxu1 %v567_v32  ;;  %v687_v32 = vld [vmem:[%s1187_s8 + $0x38] sm:$0xff] }
 0x13c   :  { %613 = vmatpush2.msra.mxu1 %v566_v33  ;;  %v686_v33 = vld [vmem:[%s1187_s8 + $0x30] sm:$0xff] }
 0x13d   :  { %614 = vmatprep.subr.mxu1 %v565_v34  ;;  %v685_v34 = vld [vmem:[%s1187_s8 + $0x28] sm:$0xff] }
 0x13e   :  { %615 = vmatpush2.msra.mxu1 %v564_v35  ;;  %v684_v35 = vld [vmem:[%s1187_s8 + $0x20] sm:$0xff] }
 0x13f   :  { %616 = vmatprep.subr.mxu1 %v563_v36  ;;  %v683_v36 = vld [vmem:[%s1187_s8 + $0x18] sm:$0xff] }
 0x140   :  { %617 = vmatpush2.msra.mxu1 %v562_v37  ;;  %v682_v37 = vld [vmem:[%s1187_s8 + $0x10] sm:$0xff] }
 0x141   :  { %618 = vmatprep.subr.mxu1 %v561_v38  ;;  %v681_v38 = vld [vmem:[%s1187_s8 + $0x8] sm:$0xff] }
 0x142   :  { %619 = vmatpush2.msra.mxu1 %v560_v40  ;;  %v680_v40 = vld [vmem:[%s1187_s8] sm:$0xff] }
 0x143   :  { %620 = vmatprep.subr.mxu1 %v559_v30  ;;  %v568_v30 = vld [vmem:[%s1186_s7] sm:$0x3]  ;;  %s993_s7 = smov [#allocation8]  }
 0x144   :  { %621 = vmatpush2.msra.mxu1 %v558_v41  ;;  %v577_v41 = vrot.slane %v568_v30, %v1085_v28  ;;  %s774_s8 = sshll.u32 %s993_s7, 4  ;;  %s775_s8 = int_to_ptr.vmem [resolvable:$true] %s774_s8 }
 0x145   :  { %622 = vmatprep.subr.mxu1 %v557_v43  ;;  %s938_s20 = scalar_lea.vmem %s775_s8, 128  ;;  %p943_p2 = scmp.lt.s32.totalorder %s775_s8, %s775_s8 }
 0x146   :  { %623 = vmatpush2.msra.mxu1 %v556_v44  ;;  %p939_p1 = scmp.ne.s32.totalorder %s775_s8, %s938_s20  ;;  %p944_p3 = scmp.lt.s32.totalorder %s938_s20, %s938_s20 }
 0x147   :  { %624 = vmatprep.subr.mxu1 %v555_v55 }
 0x148   :  { %625 = vmatpush2.msra.mxu1 %v554_v56  ;;  %p945_p4 = por %p944_p3, %p943_p2 }
 0x149   :  { %626 = vmatprep.subr.mxu1 %v553_v57 }
 0x14a   :  { %627 = vmatpush2.msra.mxu1 %v552_v58  ;;  %p946_p5 = pnand %p945_p4, %p939_p1 }
 0x14b   :  { %628 = vmatprep.subr.mxu1 %v551_v60 }
 0x14c   :  { %629 = vmatpush2.msra.mxu1 %v550_v61 }
 0x14d   :  { %630 = vmatprep.subr.mxu1 %v549_v62 }
 0x14e   :  { %631 = vmatpush2.msra.mxu1 %v548_v63 }
 0x14f   :  { %632 = vmatprep.subr.mxu1 %v547_v1 }
 0x150   :  { %633 = vmatpush2.msra.mxu1 %v546_v2 }
 0x151   :  { %634 = vmatprep.subr.mxu1 %v545_v3 }
 0x152   :  { %635 = vmatpush2.msra.mxu1 %v544_v4 }
 0x153   :  { %636 = vmatprep.subr.mxu1 %v543_v5 }
 0x154   :  { %637 = vmatpush2.msra.mxu1 %v542_v6 }
 0x155   :  { %638 = vmatprep.subr.mxu1 %v541_v7 }
 0x156   :  { %639 = vmatpush2.msra.mxu1 %v540_v8 }
 0x157   :  { %640 = vmatprep.subr.mxu1 %v539_v9 }
 0x158   :  { %641 = vmatpush2.msra.mxu1 %v538_v10 }
 0x159   :  { %642 = vmatprep.subr.mxu1 %v537_v11 }
 0x15a   :  { %643 = vmatpush2.msra.mxu1 %v536_v12 }
 0x1db   :  { %v346_v48 = vpop.f32.mrf.mxu1 }
 0x1dc   :  { %v347_v49 = vadd.f32 %v346_v48, %v273_v46 }
 0x1dd   :  { %v348_v50 = vpop.f32.mrf.mxu1 }
 0x1de   :  { %v349_v51 = vadd.f32 %v348_v50, %v277_v47  ;;  %v573_v50 = vrot.slane %v568_v30, %v1063_v39 }
 0x1e0   :  { %864 = vtanh.f32 %v349_v51 }
 0x1e1   :  { %866 = vtanh.f32 %v347_v49 }
 0x1ed   :  { %v865_v53 = vpop.eup %864 }
 0x1ee   :  { %v867_v54 = vpop.eup %866  ;;  %495 = vmatprep.mubr.f32.mxu0 %v865_v53  ;;  %v79_v53 = vsub.f32 1.0, %v1068_v42 }
 0x1ef   :  { %496 = vmatmul.mubr.f32.vlgmr.msra.gmra.mxu0 %v867_v54 }
 0x1f0   :  { %817 = vmatpush3.msra.mxu0 %v695_v22  ;;  %848 = vmatprep.mubr.msk.f32.mxu0 %vm992_vm0, %v991_v0  ;;  %v664_v58 = vrot.slane %v79_v53, %v1063_v39 }
 0x1f1   :  { %818 = vmatprep.subr.mxu0 %v991_v0 }
 0x1f2   :  { %819 = vmatpush3.msra.mxu0 %v694_v23 }
 0x1f3   :  { %820 = vmatprep.subr.mxu0 %v991_v0 }
 0x1f4   :  { %821 = vmatpush3.msra.mxu0 %v693_v24 }
 0x1f5   :  { %822 = vmatprep.subr.mxu0 %v991_v0 }
 0x1f6   :  { %823 = vmatpush3.msra.mxu0 %v692_v25 }
 0x1f7   :  { %824 = vmatprep.subr.mxu0 %v991_v0 }
 0x1f8   :  { %825 = vmatpush3.msra.mxu0 %v691_v26 }
 0x1f9   :  { %826 = vmatprep.subr.mxu0 %v991_v0 }
 0x1fa   :  { %827 = vmatpush3.msra.mxu0 %v690_v27 }
 0x1fb   :  { %828 = vmatprep.subr.mxu0 %v991_v0 }
 0x1fc   :  { %829 = vmatpush3.msra.mxu0 %v689_v29 }
 0x1fd   :  { %830 = vmatprep.subr.mxu0 %v991_v0 }
 0x1fe   :  { %831 = vmatpush3.msra.mxu0 %v688_v31 }
 0x1ff   :  { %832 = vmatprep.subr.mxu0 %v991_v0 }
 0x200   :  { %833 = vmatpush3.msra.mxu0 %v687_v32 }
 0x201   :  { %834 = vmatprep.subr.mxu0 %v991_v0 }
 0x202   :  { %835 = vmatpush3.msra.mxu0 %v686_v33 }
 0x203   :  { %836 = vmatprep.subr.mxu0 %v991_v0 }
 0x204   :  { %837 = vmatpush3.msra.mxu0 %v685_v34 }
 0x205   :  { %838 = vmatprep.subr.mxu0 %v991_v0 }
 0x206   :  { %839 = vmatpush3.msra.mxu0 %v684_v35 }
 0x207   :  { %840 = vmatprep.subr.mxu0 %v991_v0 }
 0x208   :  { %841 = vmatpush3.msra.mxu0 %v683_v36 }
 0x209   :  { %842 = vmatprep.subr.mxu0 %v991_v0 }
 0x20a   :  { %843 = vmatpush3.msra.mxu0 %v682_v37 }
 0x20b   :  { %844 = vmatprep.subr.mxu0 %v991_v0 }
 0x20c   :  { %845 = vmatpush3.msra.mxu0 %v681_v38 }
 0x20d   :  { %846 = vmatprep.subr.mxu0 %v991_v0 }
 0x20e   :  { %847 = vmatpush3.msra.mxu0 %v680_v40 }
 0x2af   :  { %v497_v16 = vpop.f32.mrf.mxu0 }
 0x2b0   :  { %v498_v17 = vadd.f32 %v497_v16, %v424_v14 }
 0x2b1   :  { %v499_v18 = vpop.f32.mrf.mxu0 }
 0x2b2   :  { %v500_v19 = vadd.f32 %v499_v18, %v428_v15 }
 0x2b4   :  { %868 = vtanh.f32 %v500_v19 }
 0x2b5   :  { %870 = vtanh.f32 %v498_v17 }
 0x2c1   :  { %v869_v20 = vpop.eup %868 }
 0x2c2   :  { %v871_v21 = vpop.eup %870  ;;  %644 = vmatprep.mubr.f32.mxu1 %v869_v20 }
 0x2c3   :  { %645 = vmatmul.mubr.f32.vlgmr.msra.gmra.mxu1 %v871_v21 }
 0x383   :  { %v646_v43 = vpop.f32.mrf.mxu1 }
 0x384   :  { %v647_v51 = vadd.f32 %v646_v43, %v573_v50 }
 0x385   :  { %v648_v44 = vpop.f32.mrf.mxu1 }
 0x386   :  { %v649_v45 = vadd.f32 %v648_v44, %v577_v41  ;;  %v657_v55 = vsub.f32 %v1075_v52, %v647_v51 }
 0x388   :  { %v651_v46 = vsub.f32 0.0, %v649_v45 }
 0x38a   :  { %v652_v47 = vmul.f32 1.442695, %v651_v46 }
 0x38c   :  { %872 = vpow2.f32 %v652_v47 }
 0x399   :  { %v873_v48 = vpop.eup %872 }
 0x39a   :  { %v654_v49 = vadd.f32 1.0, %v873_v48  ;;  %v672_v0 = vmul.f32 -0.5, %v873_v48  ;;  %v675_v28 = vand.u32 2147483647, %v873_v48 }
 0x39c   :  { %874 = vrcp.f32 %v654_v49  ;;  %v673_v54 = vadd.f32 1.0, %v672_v0  ;;  %vm676_vm1 = vcmp.lt.f32.partialorder %v675_v28, 0.0004427343 }
 0x39d   :  { %876 = vlog2.f32 %v654_v49 }
 0x39e   :  { %v674_v62 = vmul.f32 %v873_v48, %v673_v54 }
 0x3a9   :  { %v875_v56 = vpop.eup %874 }
 0x3aa   :  { %v877_v57 = vpop.eup %876  ;;  %v658_v60 = vmul.f32 %v875_v56, %v657_v55 }
 0x3ab   :  { %v671_v61 = vmul.f32 0.6931472, %v877_v57 }
 0x3ac   :  { %v659_v63 = vadd.f32 %v658_v60, %v647_v51 }
 0x3ad   :  { %v677_v1 = vsel %vm676_vm1, %v674_v62, %v671_v61 }
 0x3ae   :  { %v678_v2 = vsub.f32 0.0, %v677_v1  ;;  %v666_v3 = vmul.f32 %v664_v58, %v659_v63 }
 0x3b0   :  { %v679_v4 = vmul.f32 %v678_v2, %v664_v58  ;;  %v667_v5 = vadd.f32 %v666_v3, %v1078_v59 }
 0x3b2   :  { %849 = vmatmul.mubr.f32.vlgmr.msra.gmra.mxu0 %v679_v4  ;;  %668 = vst [vmem:[#allocation8] sm:$0xff] %v667_v5 }
 0x3b3   :  { %949 = shalt.err (!%p946_p5)
}
 0x3b4   :  { %777 = dma.vmem_to_hbm [thread:$0]  %s775_s8, 128, %s1188_s9, [#allocation4]   ;;  %vm766_vm2 = vcmask 64512  }
 0x3b5   :  { %s994_s23 = smov [#allocation9]  }
 0x3b6   :  { %s784_s24 = sshll.u32 %s994_s23, 4  ;;  %s785_s24 = int_to_ptr.vmem [resolvable:$true] %s784_s24 }
 0x3b7   :  { %s958_s25 = scalar_lea.vmem %s785_s24, 128  ;;  %p963_p7 = scmp.lt.s32.totalorder %s785_s24, %s785_s24 }
 0x3b8   :  { %p959_p6 = scmp.ne.s32.totalorder %s785_s24, %s958_s25  ;;  %p964_p8 = scmp.lt.s32.totalorder %s958_s25, %s958_s25 }
 0x3ba   :  { %p965_p9 = por %p964_p8, %p963_p7 }
 0x3bc   :  { %p966_p10 = pnand %p965_p9, %p959_p6 }
 0x472   :  { %v762_v39 = vpop.f32.mrf.mxu0 }
 0x473   :  { %767 = vst.msk [vmem:[#allocation9] sm:$0xff] %vm766_vm2, %v762_v39 }
 0x474   :  { %v850_v42 = vpop.f32.mrf.mxu0 }
 0x475   :  { %969 = shalt.err (!%p966_p10)
}
 0x476   :  { %787 = dma.vmem_to_hbm [thread:$0]  %s785_s24, 128, %s1189_s10, [#allocation10]  }
 0x477   :  { %982 = dma.done.wait [#allocation4], 128  }
 0x478   :  { %983 = vsyncadd [#allocation4], 4294967168 }
 0x479   :  { %984 = dma.done.wait [#allocation10], 128  }
 0x47a   :  { %985 = vsyncadd [#allocation10], 4294967168 }
 0x47b   :  { %794 = vsyncpa [#allocation3], 1 }
 0x47c   :  { %795 = vsyncpa [#allocation6], 1 }
 0x47d   :  { %796 = vsyncpa [#allocation4], 1 }
 0x47e   :  { %797 = vsyncpa [#allocation10], 1 }

</bundles_post_ra>
